<compile_context>
chip_gen: v6e
topology: v6e:2x2x1
jax: 0.10.0
libtpu: 0.0.40
codegen_flags: <defaults>
</compile_context>

<pallas_src>
import functools

import jax
import jax.numpy as jnp
import numpy as np
from jax.experimental import pallas as pl
from jax.experimental.pallas import tpu as pltpu


def _round_up(v, m):
    return ((v + m - 1) // m) * m


def _pick_k_chunk(k_pad):
    """Largest multiple-of-128 divisor of k_pad, capped at 1024."""
    if k_pad <= 1024:
        return k_pad
    for tk in (1024, 896, 768, 640, 512, 384, 256, 128):
        if k_pad % tk == 0:
            return tk
    return 128


def _vmem_capacity_bytes():
    """Per-core VMEM capacity; conservative 64 MiB (v7x) fallback."""
    cap = None
    try:
        info = pltpu.get_tpu_info()
        cap = getattr(info, "vmem_capacity_bytes", None)
    except Exception:
        cap = None
    if not cap or cap <= 0:
        cap = 64 * 1024 * 1024
    return int(cap)


def _pick_tb(b8, i_pad, k_pad, to, tk, budget_bytes):
    """Largest batch tile whose VMEM working set fits the budget."""
    candidates = [t for t in (1024, 512, 256, 128, 64, 32, 16, 8) if t <= max(b8, 8)]
    if not candidates:
        candidates = [8]
    fixed = (2 * i_pad * k_pad * 4        # expansion matrix E (double-buffered)
             + 4 * 8 * k_pad * 4          # phase_low / phase_height (sublane-padded)
             + 2 * k_pad * to * 2)        # coff tile (bf16)
    for tb in candidates:
        per_tb = (2 * i_pad * 4           # x tile (double-buffered)
                  + 2 * to * 4            # out tile (double-buffered)
                  + k_pad * 2             # basis cache scratch (bf16)
                  + 3 * tk * 4            # in-flight chunk temporaries (xg, x1, x2)
                  + to * 4)               # f32 accumulator
        if fixed + tb * per_tb <= budget_bytes:
            return tb
    return candidates[-1]


def _relukan_kernel(x_ref, e_ref, plo_ref, phi_ref, coff_ref, o_ref, basis_ref,
                    *, n_k, tk):
    # x_ref:     (TB, I_pad)   raw inputs (no G expansion in HBM)
    # e_ref:     (I_pad, K_pad) one-hot expansion matrix, f32
    # plo_ref:   (1, K_pad)    flattened phase_low
    # phi_ref:   (1, K_pad)    flattened phase_height
    # coff_ref:  (K_pad, TO)   norm-folded transposed coefficients, bf16
    # o_ref:     (TB, TO)      f32 output tile
    # basis_ref: (TB, K_pad)   bf16 basis cache, reused across O tiles
    jo = pl.program_id(1)  # inner ("arbitrary") axis: output tiles

    @pl.when(jo == 0)
    def _compute_basis_and_first_tile():
        acc = jnp.zeros(o_ref.shape, jnp.float32)
        for c in range(n_k):  # static unroll: interleaves VPU and MXU work
            k0 = c * tk
            # In-kernel grid expansion on the MXU: xg[b, i*G+g] = x[b, i].
            xg = jnp.dot(x_ref[...], e_ref[:, k0:k0 + tk],
                         preferred_element_type=jnp.float32)
            x1 = jnp.maximum(xg - plo_ref[:, k0:k0 + tk], 0.0)
            x2 = jnp.maximum(phi_ref[:, k0:k0 + tk] - xg, 0.0)
            p = x1 * x2
            b = (p * p).astype(jnp.bfloat16)  # norm folded into coff
            basis_ref[:, k0:k0 + tk] = b
            acc = acc + jnp.dot(b, coff_ref[k0:k0 + tk, :],
                                preferred_element_type=jnp.float32)
        o_ref[...] = acc

    @pl.when(jo != 0)
    def _reuse_cached_basis():
        o_ref[...] = jnp.dot(basis_ref[...], coff_ref[...],
                             preferred_element_type=jnp.float32)


def prepare_relukan_params(phase_low, phase_height, coff):
    """Parameter-only preprocessing (hoist out of the per-forward path)."""
    phase_low = jnp.asarray(phase_low, jnp.float32)
    phase_height = jnp.asarray(phase_height, jnp.float32)
    coff = jnp.asarray(coff, jnp.float32)
    I, O, G = coff.shape
    K = I * G
    I_pad = _round_up(I, 8)
    K_pad = _round_up(K, 128)
    TO = min(256, _round_up(O, 128))
    O_pad = _round_up(O, TO)

    # Fold norm into the coefficients: coff_mat[i*G+g, o] = coff[i,o,g]*norm[i,g]
    norm = (phase_height - phase_low) ** 4 / 16.0                       # (I, G)
    coff_mat = (coff * norm[:, None, :]).transpose(0, 2, 1).reshape(K, O)
    coff_mat = coff_mat.astype(jnp.bfloat16)
    # TODO(synk): on v7x an fp8 coff path would halve coff traffic again.

    plo_flat = phase_low.reshape(1, K)
    phi_flat = phase_height.reshape(1, K)

    # One-hot expansion matrix: E[i, i*G+g] = 1  ->  (x @ E)[b, i*G+g] = x[b, i]
    # TODO(synk): for very large input_size, chunk E along K instead of holding
    # the full (I, K) matrix resident in VMEM.
    e_np = np.kron(np.eye(I, dtype=np.float32), np.ones((1, G), np.float32))
    e_mat = jnp.asarray(e_np)

    # Pad: zero E columns + zero phases give exactly-zero basis in the K pad;
    # zero coff rows/cols make padded contributions exactly zero.
    if K_pad != K:
        plo_flat = jnp.pad(plo_flat, ((0, 0), (0, K_pad - K)))
        phi_flat = jnp.pad(phi_flat, ((0, 0), (0, K_pad - K)))
        coff_mat = jnp.pad(coff_mat, ((0, K_pad - K), (0, 0)))
        e_mat = jnp.pad(e_mat, ((0, 0), (0, K_pad - K)))
    if I_pad != I:
        e_mat = jnp.pad(e_mat, ((0, I_pad - I), (0, 0)))
    if O_pad != O:
        coff_mat = jnp.pad(coff_mat, ((0, 0), (0, O_pad - O)))

    return dict(I=I, O=O, G=G, I_pad=I_pad, K_pad=K_pad, TO=TO, O_pad=O_pad,
                plo=plo_flat, phi=phi_flat, coff_mat=coff_mat, e_mat=e_mat)


def relukan_forward(x, params):
    """x: (B, I) -> (B, O) float32, using prepared params."""
    x = jnp.asarray(x, jnp.float32)
    B, I = x.shape
    assert I == params["I"]
    O, I_pad, K_pad = params["O"], params["I_pad"], params["K_pad"]
    TO, O_pad = params["TO"], params["O_pad"]

    # ---- tiling (VMEM-budget driven: 64 MiB on v7x, 128 MiB on v5e/v6e) ----
    TK = _pick_k_chunk(K_pad)
    n_k = K_pad // TK
    B8 = _round_up(B, 8)
    vmem_cap = _vmem_capacity_bytes()
    TB = _pick_tb(B8, I_pad, K_pad, TO, TK, int(vmem_cap * 0.7))
    B_pad = _round_up(B8, TB)

    x_p = x
    if I_pad != I:
        x_p = jnp.pad(x_p, ((0, 0), (0, I_pad - I)))
    if B_pad != B:
        x_p = jnp.pad(x_p, ((0, B_pad - B), (0, 0)))

    n_b = B_pad // TB
    n_o = O_pad // TO

    kernel = functools.partial(_relukan_kernel, n_k=n_k, tk=TK)

    grid_spec = pltpu.PrefetchScalarGridSpec(
        num_scalar_prefetch=0,
        grid=(n_b, n_o),  # B outer (parallel / megacore), O inner (arbitrary)
        in_specs=[
            pl.BlockSpec((TB, I_pad), lambda ib, jo: (ib, 0)),     # x
            pl.BlockSpec((I_pad, K_pad), lambda ib, jo: (0, 0)),   # expansion E
            pl.BlockSpec((1, K_pad), lambda ib, jo: (0, 0)),       # phase_low
            pl.BlockSpec((1, K_pad), lambda ib, jo: (0, 0)),       # phase_height
            pl.BlockSpec((K_pad, TO), lambda ib, jo: (0, jo)),     # coff (bf16)
        ],
        out_specs=pl.BlockSpec((TB, TO), lambda ib, jo: (ib, jo)),
        scratch_shapes=[pltpu.VMEM((TB, K_pad), jnp.bfloat16)],    # basis cache
    )

    out = pl.pallas_call(
        kernel,
        out_shape=jax.ShapeDtypeStruct((B_pad, O_pad), jnp.float32),
        grid_spec=grid_spec,
        compiler_params=pltpu.CompilerParams(
            dimension_semantics=("parallel", "arbitrary"),
            vmem_limit_bytes=int(vmem_cap * 0.8),
        ),
    )(x_p, params["e_mat"], params["plo"], params["phi"], params["coff_mat"])

    return out[:B, :O]


def relukan_reference(x, phase_low, phase_height, coff):
    """Pure-JAX reference mirroring the PyTorch forward exactly (f32)."""
    norm = (phase_height - phase_low) ** 4 / 16.0
    xe = x[:, :, None]
    x1 = jnp.maximum(xe - phase_low[None], 0.0)
    x2 = jnp.maximum(phase_height[None] - xe, 0.0)
    basis = (x1 * x2) ** 2 * norm[None]                    # (B, I, G)
    return jnp.einsum("iog,big->bo", coff, basis)


if __name__ == "__main__":
    # module hyper-params (small, consistent with __init__)
    input_size = 16
    output_size = 32
    grid = 8
    basis_f_left_boarder = -1.0
    basis_f_right_boarder = 1.0
    init_mu = 0.0
    init_sigma = 1.0
    batch = 8

    # deterministic parameter init (mirrors __init__)
    centers = np.linspace(basis_f_left_boarder, basis_f_right_boarder, grid)
    step = (basis_f_right_boarder - basis_f_left_boarder) / (grid - 1)
    phase_low = jnp.asarray(
        np.stack([centers - step for _ in range(input_size)]), jnp.float32
    )                                                      # (I, G)
    phase_height = jnp.asarray(
        np.stack([centers + step for _ in range(input_size)]), jnp.float32
    )                                                      # (I, G)

    key = jax.random.PRNGKey(0)
    k_coff, k_x = jax.random.split(key)
    coff = init_mu + init_sigma * jax.random.normal(
        k_coff, (input_size, output_size, grid), dtype=jnp.float32
    )                                                      # (I, O, G)
    x = jax.random.normal(k_x, (batch, input_size), dtype=jnp.float32)

    params = prepare_relukan_params(phase_low, phase_height, coff)  # hoisted prep
    out = jax.block_until_ready(relukan_forward(x, params))

    ref = jax.block_until_ready(
        relukan_reference(x, phase_low, phase_height, coff)
    )
    assert out.shape == (batch, output_size)

    out_np, ref_np = np.asarray(out), np.asarray(ref)
    # bf16 matmul path -> relaxed tolerance vs the f32 reference.
    tol = 3e-2 * float(np.abs(ref_np).max()) + 1e-6
    np.testing.assert_allclose(out_np, ref_np, rtol=3e-2, atol=tol)
    print("KERNEL_OK")
</pallas_src>

<mosaic_0001>
module attributes {stable_mosaic.version = 11 : i64} {
  func.func @_relukan_kernel(%arg0: i32, %arg1: i32, %arg2: memref<8x16xf32, #tpu.memory_space<vmem>>, %arg3: memref<16x128xf32, #tpu.memory_space<vmem>>, %arg4: memref<1x128xf32, #tpu.memory_space<vmem>>, %arg5: memref<1x128xf32, #tpu.memory_space<vmem>>, %arg6: memref<128x128xbf16, #tpu.memory_space<vmem>>, %arg7: memref<8x128xf32, #tpu.memory_space<vmem>>, %arg8: memref<8x128xbf16, #tpu.memory_space<vmem>>) attributes {dimension_semantics = [#tpu.dimension_semantics<parallel>, #tpu.dimension_semantics<arbitrary>], iteration_bounds = array<i64: 1, 1>, scalar_prefetch = 0 : i64, scratch_operands = 1 : i64, tpu.core_type = #tpu.core_type<tc>, window_params = [{transform_indices = @transform_0, window_bounds = array<i64: 8, 16>}, {pipeline_mode = #tpu.pipeline_mode<synchronous>, transform_indices = @transform_1, window_bounds = array<i64: 16, 128>}, {pipeline_mode = #tpu.pipeline_mode<synchronous>, transform_indices = @transform_2, window_bounds = array<i64: 1, 128>}, {pipeline_mode = #tpu.pipeline_mode<synchronous>, transform_indices = @transform_3, window_bounds = array<i64: 1, 128>}, {transform_indices = @transform_4, window_bounds = array<i64: 128, 128>}, {transform_indices = @transform_5, window_bounds = array<i64: 8, 128>}]} {
    %c0_i32 = arith.constant 0 : i32
    %0 = arith.cmpi eq, %arg1, %c0_i32 : i32
    %1 = arith.extui %0 : i1 to i32
    %c0_i32_0 = arith.constant 0 : i32
    %2 = arith.cmpi ne, %1, %c0_i32_0 : i32
    scf.if %2 {
      %cst = arith.constant 0.000000e+00 : f32
      %6 = vector.broadcast %cst : f32 to vector<8x128xf32>
      %c0 = arith.constant 0 : index
      %c0_3 = arith.constant 0 : index
      %7 = vector.load %arg2[%c0, %c0_3] : memref<8x16xf32, #tpu.memory_space<vmem>>, vector<8x16xf32>
      %c0_4 = arith.constant 0 : index
      %c0_5 = arith.constant 0 : index
      %8 = vector.load %arg3[%c0_4, %c0_5] : memref<16x128xf32, #tpu.memory_space<vmem>>, vector<16x128xf32>
      %cst_6 = arith.constant dense<0.000000e+00> : vector<8x128xf32>
      %9 = tpu.matmul %7, %8, %cst_6 {dimension_numbers = #tpu.dot_dimension_numbers<[1], [0], [0], [1], [0, 0, 1, 1], [], []>} : vector<8x16xf32>, vector<16x128xf32>, vector<8x128xf32> -> vector<8x128xf32>
      %c0_7 = arith.constant 0 : index
      %c0_8 = arith.constant 0 : index
      %10 = vector.load %arg4[%c0_7, %c0_8] : memref<1x128xf32, #tpu.memory_space<vmem>>, vector<1x128xf32>
      %11 = vector.broadcast %10 : vector<1x128xf32> to vector<8x128xf32>
      %12 = arith.subf %9, %11 : vector<8x128xf32>
      %cst_9 = arith.constant 0.000000e+00 : f32
      %13 = vector.broadcast %cst_9 : f32 to vector<8x128xf32>
      %14 = arith.maximumf %12, %13 : vector<8x128xf32>
      %c0_10 = arith.constant 0 : index
      %c0_11 = arith.constant 0 : index
      %15 = vector.load %arg5[%c0_10, %c0_11] : memref<1x128xf32, #tpu.memory_space<vmem>>, vector<1x128xf32>
      %16 = vector.broadcast %15 : vector<1x128xf32> to vector<8x128xf32>
      %17 = arith.subf %16, %9 : vector<8x128xf32>
      %cst_12 = arith.constant 0.000000e+00 : f32
      %18 = vector.broadcast %cst_12 : f32 to vector<8x128xf32>
      %19 = arith.maximumf %17, %18 : vector<8x128xf32>
      %20 = arith.mulf %14, %19 : vector<8x128xf32>
      %21 = arith.mulf %20, %20 : vector<8x128xf32>
      %22 = arith.truncf %21 : vector<8x128xf32> to vector<8x128xbf16>
      %c0_13 = arith.constant 0 : index
      %c0_14 = arith.constant 0 : index
      %23 = vector.load %arg8[%c0_13, %c0_14] : memref<8x128xbf16, #tpu.memory_space<vmem>>, vector<8x128xbf16>
      tpu.vector_store %arg8[%c0_13, %c0_14], %22 {strides = array<i32>} : memref<8x128xbf16, #tpu.memory_space<vmem>>, vector<8x128xbf16>,
      %c0_15 = arith.constant 0 : index
      %c0_16 = arith.constant 0 : index
      %24 = vector.load %arg6[%c0_15, %c0_16] : memref<128x128xbf16, #tpu.memory_space<vmem>>, vector<128x128xbf16>
      %cst_17 = arith.constant dense<0.000000e+00> : vector<8x128xf32>
      %25 = tpu.matmul %22, %24, %cst_17 {dimension_numbers = #tpu.dot_dimension_numbers<[1], [0], [0], [1], [0, 0, 1, 1], [], []>} : vector<8x128xbf16>, vector<128x128xbf16>, vector<8x128xf32> -> vector<8x128xf32>
      %26 = arith.addf %6, %25 : vector<8x128xf32>
      %c0_18 = arith.constant 0 : index
      %c0_19 = arith.constant 0 : index
      %27 = vector.load %arg7[%c0_18, %c0_19] : memref<8x128xf32, #tpu.memory_space<vmem>>, vector<8x128xf32>
      tpu.vector_store %arg7[%c0_18, %c0_19], %26 {strides = array<i32>} : memref<8x128xf32, #tpu.memory_space<vmem>>, vector<8x128xf32>,
    } else {
    }
    %c0_i32_1 = arith.constant 0 : i32
    %3 = arith.cmpi ne, %arg1, %c0_i32_1 : i32
    %4 = arith.extui %3 : i1 to i32
    %c0_i32_2 = arith.constant 0 : i32
    %5 = arith.cmpi ne, %4, %c0_i32_2 : i32
    scf.if %5 {
      %c0 = arith.constant 0 : index
      %c0_3 = arith.constant 0 : index
      %6 = vector.load %arg8[%c0, %c0_3] : memref<8x128xbf16, #tpu.memory_space<vmem>>, vector<8x128xbf16>
      %c0_4 = arith.constant 0 : index
      %c0_5 = arith.constant 0 : index
      %7 = vector.load %arg6[%c0_4, %c0_5] : memref<128x128xbf16, #tpu.memory_space<vmem>>, vector<128x128xbf16>
      %cst = arith.constant dense<0.000000e+00> : vector<8x128xf32>
      %8 = tpu.matmul %6, %7, %cst {dimension_numbers = #tpu.dot_dimension_numbers<[1], [0], [0], [1], [0, 0, 1, 1], [], []>} : vector<8x128xbf16>, vector<128x128xbf16>, vector<8x128xf32> -> vector<8x128xf32>
      %c0_6 = arith.constant 0 : index
      %c0_7 = arith.constant 0 : index
      %9 = vector.load %arg7[%c0_6, %c0_7] : memref<8x128xf32, #tpu.memory_space<vmem>>, vector<8x128xf32>
      tpu.vector_store %arg7[%c0_6, %c0_7], %8 {strides = array<i32>} : memref<8x128xf32, #tpu.memory_space<vmem>>, vector<8x128xf32>,
    } else {
    }
    return
  }
  func.func @transform_0(%arg0: i32, %arg1: i32) -> (i32, i32) {
    %c0_i32 = arith.constant 0 : i32
    %c0_i32_0 = arith.constant 0 : i32
    return %arg0, %c0_i32 : i32, i32
  }
  func.func @transform_1(%arg0: i32, %arg1: i32) -> (i32, i32) {
    %c0_i32 = arith.constant 0 : i32
    %c0_i32_0 = arith.constant 0 : i32
    %c0_i32_1 = arith.constant 0 : i32
    return %c0_i32, %c0_i32_0 : i32, i32
  }
  func.func @transform_2(%arg0: i32, %arg1: i32) -> (i32, i32) {
    %c0_i32 = arith.constant 0 : i32
    %c0_i32_0 = arith.constant 0 : i32
    %c0_i32_1 = arith.constant 0 : i32
    return %c0_i32, %c0_i32_0 : i32, i32
  }
  func.func @transform_3(%arg0: i32, %arg1: i32) -> (i32, i32) {
    %c0_i32 = arith.constant 0 : i32
    %c0_i32_0 = arith.constant 0 : i32
    %c0_i32_1 = arith.constant 0 : i32
    return %c0_i32, %c0_i32_0 : i32, i32
  }
  func.func @transform_4(%arg0: i32, %arg1: i32) -> (i32, i32) {
    %c0_i32 = arith.constant 0 : i32
    %c0_i32_0 = arith.constant 0 : i32
    return %c0_i32, %arg1 : i32, i32
  }
  func.func @transform_5(%arg0: i32, %arg1: i32) -> (i32, i32) {
    %c0_i32 = arith.constant 0 : i32
    return %arg0, %arg1 : i32, i32
  }
}

</mosaic_0001>

<bundles_post_ra>
// kernel: tpu_custom_call.1
= control target key start
LH: loop header
LB: loop body
LE: loop exit
PB: predicated region body
PF: predicated region fallthrough
CT: control target
= control target key end

     0   :  { %10 = vsyncpa [#allocation4], 0  ;;  %s615_s0 = inlined_call_operand.hbm [shape: f32[8,16], index: 0, kind: input, shape index: {}]   ;;  %s616_s1 = inlined_call_operand.hbm [shape: f32[16,128], index: 1, kind: input, shape index: {}]   ;;  %s617_s2 = inlined_call_operand.vmem [shape: f32[1,128], index: 2, kind: input, shape index: {}]   ;;  %s618_s3 = inlined_call_operand.vmem [shape: f32[1,128], index: 3, kind: input, shape index: {}]   ;;  %s619_s4 = inlined_call_operand.hbm [shape: bf16[128,128], index: 4, kind: input, shape index: {}]   ;;  %s620_s5 = inlined_call_operand.hbm [shape: f32[8,128], index: 5, kind: output, shape index: {}]  }
   0x1   :  { %11 = vsyncpa [#allocation7], 0 }
   0x2   :  { %12 = vsyncpa [#allocation5], 0  ;;  %s557_s18 = smov [#allocation6]  }
   0x3   :  { %s28_s19 = sshll.u32 %s557_s18, 4  ;;  %s29_s19 = int_to_ptr.vmem [resolvable:$true] %s28_s19 }
   0x4   :  { %s479_s20 = scalar_lea.vmem %s29_s19, 256  ;;  %p484_p1 = scmp.lt.s32.totalorder %s29_s19, %s29_s19 }
   0x5   :  { %p480_p0 = scmp.ne.s32.totalorder %s29_s19, %s479_s20  ;;  %p485_p2 = scmp.lt.s32.totalorder %s479_s20, %s479_s20 }
   0x7   :  { %p486_p3 = por %p485_p2, %p484_p1 }
   0x9   :  { %p487_p4 = pnand %p486_p3, %p480_p0 }
   0xb   :  { %490 = shalt.err (!%p487_p4)
}
   0xc   :  { %s558_s21 = smov 128   ;;  %s559_s22 = smov 8  }
   0xd   :  { %34 = dma.hbm_to_vmem [thread:$0]  %s616_s1, 256, %s29_s19, [#allocation7], %s558_s21, %s558_s21, %s559_s22  }
   0xe   :  { %s560_s25 = smov [#allocation3]   ;;  %s561_s27 = smov [#allocation8]  }
   0xf   :  { %s19_s26 = sshll.u32 %s560_s25, 4  ;;  %s44_s28 = sshll.u32 %s561_s27, 4  ;;  %s20_s26 = int_to_ptr.vmem [resolvable:$true] %s19_s26  ;;  %s45_s28 = int_to_ptr.vmem [resolvable:$true] %s44_s28 }
  0x10   :  { %s499_s29 = scalar_lea.vmem %s20_s26, 128  ;;  %p504_p6 = scmp.lt.s32.totalorder %s20_s26, %s20_s26 }
  0x11   :  { %p500_p5 = scmp.ne.s32.totalorder %s20_s26, %s499_s29  ;;  %p505_p7 = scmp.lt.s32.totalorder %s499_s29, %s499_s29 }
  0x13   :  { %p506_p8 = por %p505_p7, %p504_p6 }
  0x15   :  { %p507_p9 = pnand %p506_p8, %p500_p5 }
  0x17   :  { %510 = shalt.err (!%p507_p9)
}
  0x18   :  { %22 = dma.hbm_to_vmem [thread:$0]  %s615_s0, 128, %s20_s26, [#allocation4]  }
  0x19   :  { %s519_s7 = scalar_lea.vmem %s45_s28, 1024  ;;  %p524_p11 = scmp.lt.s32.totalorder %s45_s28, %s45_s28 }
  0x1a   :  { %p520_p10 = scmp.ne.s32.totalorder %s45_s28, %s519_s7  ;;  %p525_p12 = scmp.lt.s32.totalorder %s519_s7, %s519_s7 }
  0x1c   :  { %p526_p13 = por %p525_p12, %p524_p11 }
  0x1e   :  { %p527_p0 = pnand %p526_p13, %p520_p10 }
  0x20   :  { %530 = shalt.err (!%p527_p0)
}
  0x21   :  { %s562_s1 = smov 64   ;;  %s563_s8 = smov 4  }
  0x22   :  { %50 = dma.hbm_to_vmem [thread:$0]  %s619_s4, 1024, %s45_s28, [#allocation7], %s562_s1, %s562_s1, %s563_s8  }
  0x23   :  { %551 = dma.done.wait [#allocation4], 128  }
  0x24   :  { %552 = vsyncadd [#allocation4], 4294967168 }
  0x25   :  { %553 = dma.done.wait [#allocation7], 1280  }
  0x26   :  { %554 = vsyncadd [#allocation7], 4294966016  ;;  %v564_v0 = vmov 0.0   ;;  %vm565_vm0 = vmmov 0   ;;  %v67_v1 = vld [vmem:[#allocation6 + $0x8] sm:$0xff]  ;;  %v66_v2 = vld [vmem:[#allocation6] sm:$0xff] }
  0x27   :  { %426 = vmatprep.subr.mxu0 %v564_v0  ;;  %430 = vmatprep.mubr.msk.f32.mxu0 %vm565_vm0, %v564_v0  ;;  %v65_v3 = vld [vmem:[#allocation3] sm:$0xff]  ;;  %vm68_vm1 = vcmask 130048   ;;  %v463_v4 = vld [vmem:[#allocation8 + $0x38] sm:$0xff]   ;;  %v464_v5 = vld [vmem:[#allocation8 + $0x30] sm:$0xff]   ;;  %s566_s13 = smov [#allocation9]  }
  0x28   :  { %433 = vmatprep.subr.bf16.mxu1 %v564_v0  ;;  %449 = vmatprep.mubr.msk.bf16.mxu1 %vm565_vm0, %v564_v0  ;;  %v465_v6 = vld [vmem:[#allocation8 + $0x28] sm:$0xff]   ;;  %v466_v7 = vld [vmem:[#allocation8 + $0x20] sm:$0xff]   ;;  %v467_v8 = vld [vmem:[#allocation8 + $0x18] sm:$0xff]   ;;  %s385_s14 = sshll.u32 %s566_s13, 4  ;;  %s386_s14 = int_to_ptr.vmem [resolvable:$true] %s385_s14 }
  0x29   :  { %427 = vmatpush3.msra.mxu0 %v67_v1  ;;  %434 = vmatpush3.bf16.msra.mxu1 %v463_v4  ;;  %v468_v9 = vld [vmem:[#allocation8 + $0x10] sm:$0xff]   ;;  %v469_v10 = vld [vmem:[#allocation8 + $0x8] sm:$0xff]   ;;  %v470_v11 = vld [vmem:[#allocation8] sm:$0xff]   ;;  %p536_p2 = scmp.lt.s32.totalorder %s386_s14, %s386_s14 }
  0x2a   :  { %428 = vmatprep.subr.mxu0 %v564_v0  ;;  %435 = vmatprep.subr.bf16.mxu1 %v564_v0  ;;  %v396_v12 = vld [vmem:[%s617_s2] ss:$0 sm:$0xff]  ;;  %s531_s2 = scalar_lea.vmem %s386_s14, 128 }
  0x2b   :  { %429 = vmatpush3.msra.mxu0 %v66_v2  ;;  %v397_v13 = vld [vmem:[%s618_s3] ss:$0 sm:$0xff]  ;;  %p532_p1 = scmp.ne.s32.totalorder %s386_s14, %s531_s2  ;;  %p537_p3 = scmp.lt.s32.totalorder %s531_s2, %s531_s2 }
  0x2c   :  { %431 = vmatmul.mubr.msk.f32.vlgmr.msra.gmra.mxu0 %vm68_vm1, %v65_v3 }
  0x2d   :  { %436 = vmatpush3.bf16.msra.mxu1 %v464_v5  ;;  %p538_p4 = por %p537_p3, %p536_p2 }
  0x2e   :  { %437 = vmatprep.subr.bf16.mxu1 %v564_v0 }
  0x2f   :  { %p539_p5 = pnand %p538_p4, %p532_p1 }
  0x31   :  { %438 = vmatpush3.bf16.msra.mxu1 %v465_v6 }
  0x32   :  { %439 = vmatprep.subr.bf16.mxu1 %v564_v0 }
  0x35   :  { %440 = vmatpush3.bf16.msra.mxu1 %v466_v7 }
  0x36   :  { %441 = vmatprep.subr.bf16.mxu1 %v564_v0 }
  0x39   :  { %442 = vmatpush3.bf16.msra.mxu1 %v467_v8 }
  0x3a   :  { %443 = vmatprep.subr.bf16.mxu1 %v564_v0 }
  0x3d   :  { %444 = vmatpush3.bf16.msra.mxu1 %v468_v9 }
  0x3e   :  { %445 = vmatprep.subr.bf16.mxu1 %v564_v0 }
  0x41   :  { %446 = vmatpush3.bf16.msra.mxu1 %v469_v10 }
  0x42   :  { %447 = vmatprep.subr.bf16.mxu1 %v564_v0 }
  0x45   :  { %448 = vmatpush3.bf16.msra.mxu1 %v470_v11 }
  0xec   :  { %v138_v14 = vpop.f32.mrf.mxu0 }
  0xed   :  { %v149_v15 = vsub.f32 %v138_v14, %v396_v12  ;;  %v158_v16 = vsub.f32 %v397_v13, %v138_v14 }
  0xee   :  { %v432_v17 = vpop.f32.mrf.mxu0 }
  0xef   :  { %v150_v18 = vmax.f32 %v149_v15, 0.0  ;;  %v159_v19 = vmax.f32 %v158_v16, 0.0 }
  0xf1   :  { %v160_v20 = vmul.f32 %v159_v19, %v150_v18 }
  0xf3   :  { %v161_v21 = vmul.f32 %v160_v20, %v160_v20 }
  0xf5   :  { %v162_v22 = vpack.c.bf16 %v161_v21, %v161_v21 }
  0xf7   :  { %450 = vmatmul.mubr.bf16.vlgmr.msra.gmra.mxu1 %v162_v22 }
 0x1b7   :  { %v262_v23 = vpop.f32.mrf.mxu1 }
 0x1b8   :  { %268 = vst [vmem:[#allocation9] sm:$0xff] %v262_v23 }
 0x1b9   :  { %v451_v24 = vpop.f32.mrf.mxu1 }
 0x1ba   :  { %542 = shalt.err (!%p539_p5)
}
 0x1bb   :  { %388 = dma.vmem_to_hbm [thread:$0]  %s386_s14, 128, %s620_s5, [#allocation5]   ;;  %v265_v25 = vpop.f32.mrf.mxu1 }
 0x1bd   :  { %v452_v26 = vpop.f32.mrf.mxu1 }
 0x1be   :  { %555 = dma.done.wait [#allocation5], 128  }
 0x1bf   :  { %556 = vsyncadd [#allocation5], 4294967168 }
 0x1c0   :  { %392 = vsyncpa [#allocation4], 1 }
 0x1c1   :  { %393 = vsyncpa [#allocation7], 1 }
 0x1c2   :  { %394 = vsyncpa [#allocation5], 1 }

</bundles_post_ra>
